<compile_context>
chip_gen: v6e
topology: v6e:2x2x1
jax: 0.10.0
libtpu: 0.0.40
codegen_flags: <defaults>
</compile_context>

<pallas_src>
import math

import jax
import jax.numpy as jnp
from jax.experimental import pallas as pl
from jax.experimental.pallas import tpu as pltpu


_TARGET_BLOCK_BYTES = 8 * 1024 * 1024   # ~8 MiB per input tile (perf review rec.)
_CHUNK_ROWS = 16                        # rows streamed per fori_loop step (2 x (8, L))
_VMEM_LIMIT = 40 * 1024 * 1024          # 2 inputs x 2 buffers x 8 MiB + headroom


def _round_down(a, b):
    return (a // b) * b


def _make_block_kernel(lanes, block_rows):
    """One full (block_rows, lanes) tile -> (8, lanes) f32 partial SSE."""
    num_chunks = block_rows // _CHUNK_ROWS
    half = _CHUNK_ROWS // 2

    def kernel(xr_ref, x_ref, o_ref):
        def body(c, acc):
            off = pl.multiple_of(c * _CHUNK_ROWS, _CHUNK_ROWS)
            xv = x_ref[pl.ds(off, _CHUNK_ROWS), :].astype(jnp.float32)
            rv = xr_ref[pl.ds(off, _CHUNK_ROWS), :].astype(jnp.float32)
            d = xv - rv
            s = d * d
            # Fold 16 rows -> 8 with pure VPU vreg adds (no per-chunk XLU reduce).
            return acc + s[:half] + s[half:]

        acc0 = jnp.zeros((half, lanes), jnp.float32)
        acc = jax.lax.fori_loop(0, num_chunks, body, acc0,
                                unroll=(2 if num_chunks > 1 else 1))
        o_ref[0] = acc

    return kernel


def _make_tail_kernel(lanes, rows):
    """Single small (rows, lanes) tile -> (1, lanes) f32 partial SSE."""
    full, rem = divmod(rows, _CHUNK_ROWS)

    def kernel(xr_ref, x_ref, o_ref):
        acc = jnp.zeros((1, lanes), jnp.float32)
        if full > 0:
            def body(c, a):
                off = pl.multiple_of(c * _CHUNK_ROWS, _CHUNK_ROWS)
                d = (x_ref[pl.ds(off, _CHUNK_ROWS), :].astype(jnp.float32)
                     - xr_ref[pl.ds(off, _CHUNK_ROWS), :].astype(jnp.float32))
                return a + jnp.sum(d * d, axis=0, keepdims=True)
            acc = jax.lax.fori_loop(0, full, body, acc)
        if rem > 0:
            lo = full * _CHUNK_ROWS
            d = (x_ref[lo:rows, :].astype(jnp.float32)
                 - xr_ref[lo:rows, :].astype(jnp.float32))
            acc = acc + jnp.sum(d * d, axis=0, keepdims=True)
        o_ref[...] = acc

    return kernel


def _tail_sse(xr2, x2):
    rows, lanes = x2.shape
    out = pl.pallas_call(
        _make_tail_kernel(lanes, rows),
        out_shape=jax.ShapeDtypeStruct((1, lanes), jnp.float32),
        compiler_params=pltpu.CompilerParams(vmem_limit_bytes=_VMEM_LIMIT),
    )(xr2, x2)
    return jnp.sum(out, dtype=jnp.float32)


def reconstruction_loss(x_reconstruction, x):
    assert x.shape == x_reconstruction.shape
    assert x.ndim >= 2

    # torch: ((x - xr)**2).sum(-1).sum(-1).mean() == total_SSE / prod(shape[:-2])
    denom = math.prod(x.shape[:-2]) if x.ndim > 2 else 1
    n = math.prod(x.shape)

    xf = x.reshape(-1)
    xrf = x_reconstruction.reshape(-1)

    # Lane-dense 2-D view (rows, lanes); zero-copy whenever n is 128-aligned.
    lanes = None
    for cand in (512, 256, 128):
        if n % cand == 0:
            lanes = cand
            break
    if lanes is None:
        # TODO(synk): zero-copy handling of non-128-aligned element counts
        # (scalar-prefetched valid-count masking over the native shape); this
        # rare fallback still materializes one padded copy of both inputs.
        lanes = 512
        padded = -(-n // lanes) * lanes
        xf = jnp.pad(xf, (0, padded - n))    # zeros contribute 0 to the SSE
        xrf = jnp.pad(xrf, (0, padded - n))
        n_elems = padded
    else:
        n_elems = n

    rows = n_elems // lanes
    x2 = xf.reshape(rows, lanes)
    xr2 = xrf.reshape(rows, lanes)

    itemsize = jnp.dtype(x.dtype).itemsize
    max_rows = max(_CHUNK_ROWS,
                   _round_down(_TARGET_BLOCK_BYTES // (lanes * itemsize),
                               _CHUNK_ROWS))

    total = jnp.zeros((), jnp.float32)
    bulk_rows = 0

    if rows >= _CHUNK_ROWS:
        # >= 2 blocks when possible (v7x megacore), each a full in-bounds tile
        # of <= ~8 MiB/input; the row remainder goes to the tiny tail call.
        nb_target = max(2, -(-rows // max_rows))
        block_rows = max(_CHUNK_ROWS,
                         _round_down(rows // nb_target, _CHUNK_ROWS))
        num_blocks = rows // block_rows
        bulk_rows = num_blocks * block_rows

        cost = pl.CostEstimate(
            flops=3 * bulk_rows * lanes,
            transcendentals=0,
            bytes_accessed=2 * bulk_rows * lanes * itemsize
            + num_blocks * 8 * lanes * 4,
        )
        partials = pl.pallas_call(
            _make_block_kernel(lanes, block_rows),
            out_shape=jax.ShapeDtypeStruct((num_blocks, 8, lanes), jnp.float32),
            grid=(num_blocks,),
            in_specs=[
                pl.BlockSpec((block_rows, lanes), lambda i: (i, 0)),
                pl.BlockSpec((block_rows, lanes), lambda i: (i, 0)),
            ],
            out_specs=pl.BlockSpec((1, 8, lanes), lambda i: (i, 0, 0)),
            compiler_params=pltpu.CompilerParams(
                dimension_semantics=("parallel",),
                vmem_limit_bytes=_VMEM_LIMIT,
            ),
            cost_estimate=cost,
        )(xr2, x2)
        total = total + jnp.sum(partials, dtype=jnp.float32)

    if rows > bulk_rows:
        # Row remainder (< one block). Slicing only the tail keeps the wrapper
        # from copying the full tensors; when there is no bulk the whole (tiny)
        # slab is passed through untouched (zero-copy).
        if bulk_rows == 0:
            xt, xrt = x2, xr2
        else:
            xt, xrt = x2[bulk_rows:], xr2[bulk_rows:]
        total = total + _tail_sse(xrt, xt)

    return total / jnp.float32(denom)


if __name__ == "__main__":
    key = jax.random.PRNGKey(0)
    k1, k2, k3, k4, k5, k6, k7, k8 = jax.random.split(key, 8)

    # Primary: small shape implied by the module (B, C, H, W).
    x = jax.random.normal(k1, (2, 4, 16, 16), dtype=jnp.float32)
    xr = jax.random.normal(k2, (2, 4, 16, 16), dtype=jnp.float32)
    loss = reconstruction_loss(xr, x)
    jax.block_until_ready(loss)
    ref = jnp.mean(jnp.sum(jnp.sum((x - xr) ** 2, axis=-1), axis=-1))
    assert jnp.allclose(loss, ref, rtol=1e-5, atol=1e-5), (loss, ref)

    # Multi-block path with a row remainder (bulk kernel + tiny tail call).
    x_m = jax.random.normal(k3, (2, 4, 50, 64), dtype=jnp.float32)
    xr_m = jax.random.normal(k4, (2, 4, 50, 64), dtype=jnp.float32)
    loss_m = reconstruction_loss(xr_m, x_m)
    ref_m = jnp.mean(jnp.sum(jnp.sum((x_m - xr_m) ** 2, axis=-1), axis=-1))
    assert jnp.allclose(loss_m, ref_m, rtol=1e-5, atol=1e-5), (loss_m, ref_m)

    # Odd, non-128-aligned element count (exercises the rare padded fallback).
    x_o = jax.random.normal(k5, (3, 5, 17, 23), dtype=jnp.float32)
    xr_o = jax.random.normal(k6, (3, 5, 17, 23), dtype=jnp.float32)
    loss_o = reconstruction_loss(xr_o, x_o)
    ref_o = jnp.mean(jnp.sum(jnp.sum((x_o - xr_o) ** 2, axis=-1), axis=-1))
    assert jnp.allclose(loss_o, ref_o, rtol=1e-5, atol=1e-5), (loss_o, ref_o)

    # Larger, exactly-tiled multi-block case (no tail, fori_loop streaming).
    x_b = jax.random.normal(k7, (4, 4, 256, 256), dtype=jnp.float32)
    xr_b = jax.random.normal(k8, (4, 4, 256, 256), dtype=jnp.float32)
    loss_b = reconstruction_loss(xr_b, x_b)
    ref_b = jnp.mean(jnp.sum(jnp.sum((x_b - xr_b) ** 2, axis=-1), axis=-1))
    assert jnp.allclose(loss_b, ref_b, rtol=1e-4, atol=1e-4), (loss_b, ref_b)

    jax.block_until_ready((loss, loss_m, loss_o, loss_b))
    print("KERNEL_OK")
</pallas_src>

<mosaic_0001>
module attributes {stable_mosaic.version = 11 : i64} {
  func.func @kernel(%arg0: memref<4x512xf32, #tpu.memory_space<vmem>>, %arg1: memref<4x512xf32, #tpu.memory_space<vmem>>, %arg2: memref<1x512xf32, #tpu.memory_space<vmem>>) attributes {dimension_semantics = [], scalar_prefetch = 0 : i64, scratch_operands = 0 : i64, tpu.core_type = #tpu.core_type<tc>} {
    %cst = arith.constant 0.000000e+00 : f32
    %0 = vector.broadcast %cst : f32 to vector<1x512xf32>
    %c0 = arith.constant 0 : index
    %c0_0 = arith.constant 0 : index
    %1 = vector.load %arg1[%c0, %c0_0] : memref<4x512xf32, #tpu.memory_space<vmem>>, vector<4x512xf32>
    %c0_1 = arith.constant 0 : index
    %c0_2 = arith.constant 0 : index
    %2 = vector.load %arg0[%c0_1, %c0_2] : memref<4x512xf32, #tpu.memory_space<vmem>>, vector<4x512xf32>
    %3 = arith.subf %1, %2 : vector<4x512xf32>
    %4 = arith.mulf %3, %3 : vector<4x512xf32>
    %cst_3 = arith.constant dense<0.000000e+00> : vector<512xf32>
    %5 = vector.multi_reduction <add>, %4, %cst_3 [0] : vector<4x512xf32> to vector<512xf32>
    %6 = vector.shape_cast %5 : vector<512xf32> to vector<1x512xf32>
    %7 = arith.addf %0, %6 : vector<1x512xf32>
    %c0_4 = arith.constant 0 : index
    %c0_5 = arith.constant 0 : index
    %8 = vector.load %arg2[%c0_4, %c0_5] : memref<1x512xf32, #tpu.memory_space<vmem>>, vector<1x512xf32>
    tpu.vector_store %arg2[%c0_4, %c0_5], %7 {strides = array<i32>} : memref<1x512xf32, #tpu.memory_space<vmem>>, vector<1x512xf32>,
    return
  }
}

</mosaic_0001>

<bundles_post_ra>
// kernel: tpu_custom_call.1
= control target key start
LH: loop header
LB: loop body
LE: loop exit
PB: predicated region body
PF: predicated region fallthrough
CT: control target
= control target key end

     0   :  { %7 = vsyncpa [#allocation3], 0  ;;  %s231_s0 = inlined_call_operand.hbm [shape: f32[4,512], index: 0, kind: input, shape index: {}]   ;;  %s232_s1 = inlined_call_operand.hbm [shape: f32[4,512], index: 1, kind: input, shape index: {}]   ;;  %s233_s2 = inlined_call_operand.hbm [shape: f32[1,512], index: 2, kind: output, shape index: {}]  }
   0x1   :  { %8 = vsyncpa [#allocation6], 0 }
   0x2   :  { %9 = vsyncpa [#allocation4], 0  ;;  %s203_s9 = smov [#allocation2]   ;;  %s204_s11 = smov [#allocation5]  }
   0x3   :  { %s16_s10 = sshll.u32 %s203_s9, 4  ;;  %s26_s12 = sshll.u32 %s204_s11, 4  ;;  %s17_s10 = int_to_ptr.vmem [resolvable:$true] %s16_s10  ;;  %s27_s12 = int_to_ptr.vmem [resolvable:$true] %s26_s12 }
   0x4   :  { %s145_s13 = scalar_lea.vmem %s17_s10, 256  ;;  %p150_p1 = scmp.lt.s32.totalorder %s17_s10, %s17_s10 }
   0x5   :  { %p146_p0 = scmp.ne.s32.totalorder %s17_s10, %s145_s13  ;;  %p151_p2 = scmp.lt.s32.totalorder %s145_s13, %s145_s13 }
   0x7   :  { %p152_p3 = por %p151_p2, %p150_p1 }
   0x9   :  { %p153_p4 = pnand %p152_p3, %p146_p0 }
   0xb   :  { %156 = shalt.err (!%p153_p4)
}
   0xc   :  { %19 = dma.hbm_to_vmem [thread:$0]  %s231_s0, 256, %s17_s10, [#allocation3]  }
   0xd   :  { %s165_s16 = scalar_lea.vmem %s27_s12, 256  ;;  %p170_p6 = scmp.lt.s32.totalorder %s27_s12, %s27_s12 }
   0xe   :  { %p166_p5 = scmp.ne.s32.totalorder %s27_s12, %s165_s16  ;;  %p171_p7 = scmp.lt.s32.totalorder %s165_s16, %s165_s16 }
  0x10   :  { %p172_p8 = por %p171_p7, %p170_p6 }
  0x12   :  { %p173_p9 = pnand %p172_p8, %p166_p5 }
  0x14   :  { %176 = shalt.err (!%p173_p9)
}
  0x15   :  { %29 = dma.hbm_to_vmem [thread:$0]  %s232_s1, 256, %s27_s12, [#allocation6]  }
  0x16   :  { %197 = dma.done.wait [#allocation3], 256  }
  0x17   :  { %198 = vsyncadd [#allocation3], 4294967040 }
  0x18   :  { %199 = dma.done.wait [#allocation6], 256  }
  0x19   :  { %200 = vsyncadd [#allocation6], 4294967040  ;;  %v36_v0 = vld [vmem:[#allocation5] sm:$0xff]  ;;  %v37_v1 = vld [vmem:[#allocation5 + $0x8] sm:$0xff]  ;;  %vm50_vm0 = vcmask 1043456   ;;  %v92_v24 = vlaneseq  ;;  %s206_s0 = smov [#allocation7]  }
  0x1a   :  { %v38_v2 = vld [vmem:[#allocation2] sm:$0xff]  ;;  %v39_v3 = vld [vmem:[#allocation2 + $0x8] sm:$0xff]  ;;  %v205_v22 = vmov 1966171168   ;;  %s123_s1 = sshll.u32 %s206_s0, 4  ;;  %s124_s1 = int_to_ptr.vmem [resolvable:$true] %s123_s1 }
  0x1b   :  { %v40_v4 = vsub.f32 %v36_v0, %v38_v2  ;;  %v41_v5 = vsub.f32 %v37_v1, %v39_v3  ;;  %v90_v23 = vunpack.c.l.s4 %v205_v22  ;;  %v93_v34 = vshrl.u32 %v92_v24, 7  ;;  %s177_s19 = scalar_lea.vmem %s124_s1, 64  ;;  %p182_p11 = scmp.lt.s32.totalorder %s124_s1, %s124_s1 }
  0x1c   :  { %vm114_vm1 = vcmp.lt.s32.totalorder %v92_v24, 512  ;;  %p178_p10 = scmp.ne.s32.totalorder %s124_s1, %s177_s19  ;;  %p183_p12 = scmp.lt.s32.totalorder %s177_s19, %s177_s19 }
  0x1d   :  { %v42_v6 = vmul.f32 %v40_v4, %v40_v4  ;;  %v43_v7 = vmul.f32 %v41_v5, %v41_v5  ;;  %v91_v33 = vunpack.c.0.s8 %v90_v23 }
  0x1e   :  { %p184_p13 = por %p183_p12, %p182_p11 }
  0x1f   :  { %v46_v8 = vcombine.high %v42_v6, %v42_v6  ;;  %v51_v9 = vsel %vm50_vm0, %v42_v6, 0.0  ;;  %v47_v10 = vcombine.high %v43_v7, %v43_v7  ;;  %v65_v12 = vsel %vm50_vm0, %v43_v7, 0.0 }
  0x20   :  { %v52_v11 = vrot.slane %v51_v9, 4  ;;  %v66_v14 = vrot.slane %v65_v12, 4  ;;  %v94_v42 = vsub.s32 %v91_v33, %v93_v34  ;;  %p185_p0 = pnand %p184_p13, %p178_p10 }
  0x21   :  { %v58_v13 = vsel %vm50_vm0, %v46_v8, 0.0  ;;  %v72_v17 = vsel %vm50_vm0, %v47_v10, 0.0 }
  0x22   :  { %v53_v15 = vadd.f32 %v52_v11, %v51_v9  ;;  %v59_v16 = vrot.slane %v58_v13, 4  ;;  %v67_v18 = vadd.f32 %v66_v14, %v65_v12  ;;  %v73_v19 = vrot.slane %v72_v17, 4 }
  0x24   :  { %v54_v20 = vrot.slane %v53_v15, 2  ;;  %v60_v21 = vadd.f32 %v59_v16, %v58_v13  ;;  %v68_v25 = vrot.slane %v67_v18, 2  ;;  %v74_v26 = vadd.f32 %v73_v19, %v72_v17 }
  0x26   :  { %v55_v27 = vadd.f32 %v54_v20, %v53_v15  ;;  %v61_v28 = vrot.slane %v60_v21, 2  ;;  %v69_v29 = vadd.f32 %v68_v25, %v67_v18  ;;  %v75_v30 = vrot.slane %v74_v26, 2 }
  0x28   :  { %v56_v31 = vrot.slane %v55_v27, 1  ;;  %v62_v32 = vadd.f32 %v61_v28, %v60_v21  ;;  %v70_v35 = vrot.slane %v69_v29, 1  ;;  %v76_v36 = vadd.f32 %v75_v30, %v74_v26 }
  0x2a   :  { %v57_v37 = vadd.f32 %v56_v31, %v55_v27  ;;  %v63_v38 = vrot.slane %v62_v32, 1  ;;  %v71_v39 = vadd.f32 %v70_v35, %v69_v29  ;;  %v77_v40 = vrot.slane %v76_v36, 1 }
  0x2c   :  { %v64_v41 = vadd.f32 %v63_v38, %v62_v32  ;;  %v78_v43 = vadd.f32 %v77_v40, %v76_v36 }
  0x2e   :  { %v87_v44 = vcombine.low %v57_v37, %v64_v41  ;;  %v88_v45 = vcombine.low %v71_v39, %v78_v43 }
  0x30   :  { %v95_v46 = vrot.slane %v87_v44, %v94_v42  ;;  %v102_v47 = vrot.slane %v88_v45, %v94_v42 }
  0x32   :  { %v103_v48 = vcombine.low %v95_v46, %v102_v47 }
  0x34   :  { %v110_v49 = vrot.slane %v103_v48, %v94_v42 }
  0x36   :  { %116 = vst.msk [vmem:[#allocation7] sm:$0xf] %vm114_vm1, %v110_v49 }
  0x37   :  { %188 = shalt.err (!%p185_p0)
}
  0x38   :  { %126 = dma.vmem_to_hbm [thread:$0]  %s124_s1, 64, %s233_s2, [#allocation4]  }
  0x39   :  { %201 = dma.done.wait [#allocation4], 64  }
  0x3a   :  { %202 = vsyncadd [#allocation4], 4294967232 }
  0x3b   :  { %130 = vsyncpa [#allocation3], 1 }
  0x3c   :  { %131 = vsyncpa [#allocation6], 1 }
  0x3d   :  { %132 = vsyncpa [#allocation4], 1 }

</bundles_post_ra>
